<compile_context>
chip_gen: v7x
topology: tpu7x:2x2x1
jax: 0.10.0
libtpu: 0.0.40
codegen_flags: <defaults>
</compile_context>

<pallas_src>
import jax
import jax.numpy as jnp
from jax.experimental import pallas as pl
from jax.experimental.pallas import tpu as pltpu


def _round_up(x, m):
    return ((x + m - 1) // m) * m


# ----------------------------------------------------------------------------
# Fused kernel: patch-embed + 2x (1x1 conv) + folded head; bias/ReLU/tanh inline
# (BN scale is pre-folded into the weights, so only +bias remains per layer).
# ----------------------------------------------------------------------------
def fused_unet_kernel(x_ref, w1_ref, b1_ref, w2_ref, b2_ref,
                      w3_ref, b3_ref, w4_ref, b4_ref, o_ref):
    cdt = w1_ref.dtype  # matmul operand dtype (bf16)
    h = jnp.dot(x_ref[...], w1_ref[...], preferred_element_type=jnp.float32)
    h = jnp.maximum(h + b1_ref[...], 0.0)
    h = jnp.dot(h.astype(cdt), w2_ref[...], preferred_element_type=jnp.float32)
    h = jnp.maximum(h + b2_ref[...], 0.0)
    h = jnp.dot(h.astype(cdt), w3_ref[...], preferred_element_type=jnp.float32)
    h = jnp.maximum(h + b3_ref[...], 0.0)
    y = jnp.dot(h.astype(cdt), w4_ref[...], preferred_element_type=jnp.float32)
    o_ref[...] = jnp.tanh(y + b4_ref[...]).astype(o_ref.dtype)


def fused_unet_mlp(x, w1, b1, w2, b2, w3, b3, w4, b4, *, tm=4096):
    """x: (M, 48) bf16. Returns (M, 48) bf16 = tanh-ed, head-folded activations."""
    M, Cin = x.shape
    Cout = w4.shape[1]

    # No jnp.pad: shrink the tile for tiny M, otherwise let the last grid block
    # be ragged (Pallas masks the out-of-bounds rows on read and write).
    tm = min(tm, _round_up(M, 16))
    grid_m = pl.cdiv(M, tm)

    full2 = lambda i: (0, 0)
    return pl.pallas_call(
        fused_unet_kernel,
        out_shape=jax.ShapeDtypeStruct((M, Cout), jnp.bfloat16),
        grid_spec=pltpu.PrefetchScalarGridSpec(
            num_scalar_prefetch=0,
            grid=(grid_m,),
            in_specs=[
                pl.BlockSpec((tm, Cin), lambda i: (i, 0)),
                pl.BlockSpec(w1.shape, full2),
                pl.BlockSpec(b1.shape, full2),
                pl.BlockSpec(w2.shape, full2),
                pl.BlockSpec(b2.shape, full2),
                pl.BlockSpec(w3.shape, full2),
                pl.BlockSpec(b3.shape, full2),
                pl.BlockSpec(w4.shape, full2),
                pl.BlockSpec(b4.shape, full2),
            ],
            out_specs=pl.BlockSpec((tm, Cout), lambda i: (i, 0)),
        ),
        compiler_params=pltpu.CompilerParams(
            dimension_semantics=("parallel",),
            # <= ~48 MiB keeps v7x (64 MiB per-TC VMEM) safe while allowing the
            # larger tm; per-step resident set at tm=4096 is ~12-16 MiB.
            vmem_limit_bytes=48 * 1024 * 1024,
        ),
    )(x, w1, b1, w2, b2, w3, b3, w4, b4)


# ----------------------------------------------------------------------------
# Parameter construction (deterministic, PyTorch layer shapes)
# ----------------------------------------------------------------------------
def make_params(key):
    def conv_w(k, cout, cin, kh, kw):
        return jax.random.normal(k, (cout, cin, kh, kw), jnp.float32) * 0.1

    def bn(k, c):
        k1, k2, k3, k4 = jax.random.split(k, 4)
        gamma = jax.random.uniform(k1, (c,), jnp.float32, 0.5, 1.5)
        beta = jax.random.normal(k2, (c,), jnp.float32) * 0.1
        mean = jax.random.normal(k3, (c,), jnp.float32) * 0.1
        var = jax.random.uniform(k4, (c,), jnp.float32, 0.5, 1.5)
        return gamma, beta, mean, var

    ks = jax.random.split(key, 12)
    p = {}
    p["w1"] = conv_w(ks[0], 48, 3, 4, 4)
    p["c1b"] = jax.random.normal(ks[1], (48,), jnp.float32) * 0.1
    p["bn1"] = bn(ks[2], 48)
    p["w2"] = conv_w(ks[3], 48, 48, 1, 1)
    p["c2b"] = jax.random.normal(ks[4], (48,), jnp.float32) * 0.1
    p["bn2"] = bn(ks[5], 48)
    p["w3"] = conv_w(ks[6], 512, 48, 1, 1)
    p["c3b"] = jax.random.normal(ks[7], (512,), jnp.float32) * 0.1
    p["bn3"] = bn(ks[8], 512)
    p["w4"] = conv_w(ks[9], 3, 32, 1, 1)
    p["c4b"] = jax.random.normal(ks[10], (3,), jnp.float32) * 0.1
    return p


# ----------------------------------------------------------------------------
# Parameter prep: fold BN scale INTO the weights (f32) and build the folded
# (512,48) PixelShuffle+head matrix.  Done once, outside the hot loop.
# ----------------------------------------------------------------------------
def prepare_mats(p, eps=1e-5):
    def bn_fold(conv_bias, bn_params):
        gamma, beta, mean, var = bn_params
        s = gamma / jnp.sqrt(var + eps)
        b = beta + s * (conv_bias - mean)
        return s, b

    s1, b1 = bn_fold(p["c1b"], p["bn1"])
    s2, b2 = bn_fold(p["c2b"], p["bn2"])
    s3, b3 = bn_fold(p["c3b"], p["bn3"])

    # Weights as (Cin_flat, Cout) matrices with the BN scale folded per column.
    w1 = p["w1"].reshape(48, 48).T * s1[None, :]     # (3*4*4, 48)
    w2 = p["w2"].reshape(48, 48).T * s2[None, :]     # (48, 48)
    w3 = p["w3"].reshape(512, 48).T * s3[None, :]    # (48, 512)

    # Fold the post-PixelShuffle 1x1 conv (32->3) into a block-structured
    # (512,48) matrix: row c*16+p  ->  columns p*3..p*3+2 with weight w4[:,c]
    # (p = r1*4+r2 PixelShuffle sub-position, oc = RGB output channel).
    w4_mat = p["w4"].reshape(3, 32).T                # (32, 3)
    eye16 = jnp.eye(16, dtype=jnp.float32)
    w4_big = jnp.einsum("co,pq->cpqo", w4_mat, eye16).reshape(512, 48)
    b4_big = jnp.tile(p["c4b"], 16)                  # (48,)

    return (w1, b1[None, :], w2, b2[None, :], w3, b3[None, :],
            w4_big, b4_big[None, :])                 # biases stay f32


# ----------------------------------------------------------------------------
# Full forward pass (hot path = one fused Pallas kernel, layout glue in XLA)
# ----------------------------------------------------------------------------
def unet_forward(x_nchw, p, *, tm=4096):
    N, C, H, W = x_nchw.shape
    r = 4
    Hp, Wp = H // r, W // r
    cdt = jnp.bfloat16

    # Patch extraction for the 4x4/stride-4 conv: (N*Hp*Wp, C*r*r); patch
    # features ordered (cin, kh, kw) to match PyTorch conv-weight layout.
    # bf16 cast FIRST so it fuses into the transpose (halves glue HBM traffic).
    xp = (x_nchw.astype(cdt)
          .reshape(N, C, Hp, r, Wp, r)
          .transpose(0, 2, 4, 1, 3, 5)
          .reshape(N * Hp * Wp, C * r * r))

    w1, b1, w2, b2, w3, b3, w4, b4 = prepare_mats(p)
    y = fused_unet_mlp(xp,
                       w1.astype(cdt), b1, w2.astype(cdt), b2,
                       w3.astype(cdt), b3, w4.astype(cdt), b4,
                       tm=tm)                        # (N*Hp*Wp, 48) bf16

    # Undo the head-column packing + PixelShuffle(4): column p*3+oc with
    # p = r1*4 + r2 goes to spatial offset (r1, r2) inside each 4x4 patch.
    # TODO(synk): if the consumer accepts NHWC / bf16, drop the final
    #             transpose + f32 cast (kept here for PyTorch NCHW-f32 parity).
    y = (y.reshape(N, Hp, Wp, r, r, 3)
         .transpose(0, 1, 3, 2, 4, 5)
         .reshape(N, H, W, 3)
         .transpose(0, 3, 1, 2))
    return y.astype(jnp.float32)


# ----------------------------------------------------------------------------
# References.
#   * unet_reference_folded: mirrors the kernel exactly (same folded matrices,
#     bf16 operand rounding, f32 accumulation, bf16 output) -> tight check.
#   * unet_reference_exact: exact f32 PyTorch ordering (conv -> BN -> ReLU,
#     real PixelShuffle, head conv) -> loose sanity check.
# ----------------------------------------------------------------------------
def unet_reference_folded(x_nchw, p):
    N, C, H, W = x_nchw.shape
    r = 4
    Hp, Wp = H // r, W // r
    xp = (x_nchw.reshape(N, C, Hp, r, Wp, r)
          .transpose(0, 2, 4, 1, 3, 5)
          .reshape(N * Hp * Wp, C * r * r))
    w1, b1, w2, b2, w3, b3, w4, b4 = prepare_mats(p)

    def mm(a, w):
        a = a.astype(jnp.bfloat16).astype(jnp.float32)
        w = w.astype(jnp.bfloat16).astype(jnp.float32)
        return a @ w

    h = jnp.maximum(mm(xp, w1) + b1, 0.0)
    h = jnp.maximum(mm(h, w2) + b2, 0.0)
    h = jnp.maximum(mm(h, w3) + b3, 0.0)
    y = jnp.tanh(mm(h, w4) + b4).astype(jnp.bfloat16)
    y = (y.reshape(N, Hp, Wp, r, r, 3)
         .transpose(0, 1, 3, 2, 4, 5)
         .reshape(N, H, W, 3)
         .transpose(0, 3, 1, 2))
    return y.astype(jnp.float32)


def unet_reference_exact(x_nchw, p, eps=1e-5):
    N, C, H, W = x_nchw.shape
    r = 4
    Hp, Wp = H // r, W // r
    xp = (x_nchw.reshape(N, C, Hp, r, Wp, r)
          .transpose(0, 2, 4, 1, 3, 5)
          .reshape(N * Hp * Wp, C * r * r))

    def bn(h, bnp):
        gamma, beta, mean, var = bnp
        return (h - mean) * (gamma / jnp.sqrt(var + eps)) + beta

    h = xp @ p["w1"].reshape(48, 48).T + p["c1b"]
    h = jnp.maximum(bn(h, p["bn1"]), 0.0)
    h = h @ p["w2"].reshape(48, 48).T + p["c2b"]
    h = jnp.maximum(bn(h, p["bn2"]), 0.0)
    h = h @ p["w3"].reshape(512, 48).T + p["c3b"]
    h = jnp.maximum(bn(h, p["bn3"]), 0.0)
    # PixelShuffle(4): channel c*16 + r1*4 + r2 -> channel c at offset (r1,r2)
    h = (h.reshape(N, Hp, Wp, 32, r, r)
         .transpose(0, 1, 4, 2, 5, 3)
         .reshape(N * H * W, 32))
    y = jnp.tanh(h @ p["w4"].reshape(3, 32).T + p["c4b"])
    return y.reshape(N, H, W, 3).transpose(0, 3, 1, 2)


if __name__ == "__main__":
    key = jax.random.PRNGKey(0)
    kx, kp, kx2 = jax.random.split(key, 3)

    params = make_params(kp)

    # Small shape consistent with the PyTorch module (3-ch NCHW, spatial % 4 == 0).
    N, C, H, W = 2, 3, 16, 16
    x = jax.random.normal(kx, (N, C, H, W), jnp.float32)

    out = jax.block_until_ready(unet_forward(x, params))
    assert out.shape == (N, 3, H, W), out.shape

    # Tight check vs a reference with identical folded matrices + bf16 rounding.
    ref_tight = jax.block_until_ready(unet_reference_folded(x, params))
    err = float(jnp.max(jnp.abs(out - ref_tight)))
    assert err < 1e-2, err

    # Loose sanity check vs the exact f32 PyTorch-ordering reference.
    ref_exact = jax.block_until_ready(unet_reference_exact(x, params))
    err32 = float(jnp.max(jnp.abs(out - ref_exact)))
    assert err32 < 8e-2, err32

    # Second shape exercising a multi-step grid with a ragged (masked) last
    # M block: M = 2*17*17 = 578 rows, tm=128 -> 5 grid steps, last one partial.
    N2, H2, W2 = 2, 68, 68
    x2 = jax.random.normal(kx2, (N2, C, H2, W2), jnp.float32)
    out2 = jax.block_until_ready(unet_forward(x2, params, tm=128))
    assert out2.shape == (N2, 3, H2, W2), out2.shape
    err2 = float(jnp.max(jnp.abs(out2 - unet_reference_folded(x2, params))))
    assert err2 < 1e-2, err2

    print("KERNEL_OK")
</pallas_src>

<mosaic_0001>
module attributes {stable_mosaic.version = 11 : i64} {
  func.func @fused_unet_kernel(%arg0: i32, %arg1: memref<32x48xbf16, #tpu.memory_space<vmem>>, %arg2: memref<48x48xbf16, #tpu.memory_space<vmem>>, %arg3: memref<1x48xf32, #tpu.memory_space<vmem>>, %arg4: memref<48x48xbf16, #tpu.memory_space<vmem>>, %arg5: memref<1x48xf32, #tpu.memory_space<vmem>>, %arg6: memref<48x512xbf16, #tpu.memory_space<vmem>>, %arg7: memref<1x512xf32, #tpu.memory_space<vmem>>, %arg8: memref<512x48xbf16, #tpu.memory_space<vmem>>, %arg9: memref<1x48xf32, #tpu.memory_space<vmem>>, %arg10: memref<32x48xbf16, #tpu.memory_space<vmem>>) attributes {dimension_semantics = [#tpu.dimension_semantics<parallel>], iteration_bounds = array<i64: 1>, scalar_prefetch = 0 : i64, scratch_operands = 0 : i64, tpu.core_type = #tpu.core_type<tc>, window_params = [{transform_indices = @transform_0, window_bounds = array<i64: 32, 48>}, {pipeline_mode = #tpu.pipeline_mode<synchronous>, transform_indices = @transform_1, window_bounds = array<i64: 48, 48>}, {pipeline_mode = #tpu.pipeline_mode<synchronous>, transform_indices = @transform_2, window_bounds = array<i64: 1, 48>}, {pipeline_mode = #tpu.pipeline_mode<synchronous>, transform_indices = @transform_3, window_bounds = array<i64: 48, 48>}, {pipeline_mode = #tpu.pipeline_mode<synchronous>, transform_indices = @transform_4, window_bounds = array<i64: 1, 48>}, {pipeline_mode = #tpu.pipeline_mode<synchronous>, transform_indices = @transform_5, window_bounds = array<i64: 48, 512>}, {pipeline_mode = #tpu.pipeline_mode<synchronous>, transform_indices = @transform_6, window_bounds = array<i64: 1, 512>}, {pipeline_mode = #tpu.pipeline_mode<synchronous>, transform_indices = @transform_7, window_bounds = array<i64: 512, 48>}, {pipeline_mode = #tpu.pipeline_mode<synchronous>, transform_indices = @transform_8, window_bounds = array<i64: 1, 48>}, {transform_indices = @transform_9, window_bounds = array<i64: 32, 48>}]} {
    %c0 = arith.constant 0 : index
    %c0_0 = arith.constant 0 : index
    %0 = vector.load %arg1[%c0, %c0_0] : memref<32x48xbf16, #tpu.memory_space<vmem>>, vector<32x48xbf16>
    %c0_1 = arith.constant 0 : index
    %c0_2 = arith.constant 0 : index
    %1 = vector.load %arg2[%c0_1, %c0_2] : memref<48x48xbf16, #tpu.memory_space<vmem>>, vector<48x48xbf16>
    %cst = arith.constant dense<0.000000e+00> : vector<32x48xf32>
    %2 = tpu.matmul %0, %1, %cst {dimension_numbers = #tpu.dot_dimension_numbers<[1], [0], [0], [1], [0, 0, 1, 1], [], []>} : vector<32x48xbf16>, vector<48x48xbf16>, vector<32x48xf32> -> vector<32x48xf32>
    %c0_3 = arith.constant 0 : index
    %c0_4 = arith.constant 0 : index
    %3 = vector.load %arg3[%c0_3, %c0_4] : memref<1x48xf32, #tpu.memory_space<vmem>>, vector<1x48xf32>
    %4 = vector.broadcast %3 : vector<1x48xf32> to vector<32x48xf32>
    %5 = arith.addf %2, %4 : vector<32x48xf32>
    %cst_5 = arith.constant 0.000000e+00 : f32
    %6 = vector.broadcast %cst_5 : f32 to vector<32x48xf32>
    %7 = arith.maximumf %5, %6 : vector<32x48xf32>
    %8 = arith.truncf %7 : vector<32x48xf32> to vector<32x48xbf16>
    %c0_6 = arith.constant 0 : index
    %c0_7 = arith.constant 0 : index
    %9 = vector.load %arg4[%c0_6, %c0_7] : memref<48x48xbf16, #tpu.memory_space<vmem>>, vector<48x48xbf16>
    %cst_8 = arith.constant dense<0.000000e+00> : vector<32x48xf32>
    %10 = tpu.matmul %8, %9, %cst_8 {dimension_numbers = #tpu.dot_dimension_numbers<[1], [0], [0], [1], [0, 0, 1, 1], [], []>} : vector<32x48xbf16>, vector<48x48xbf16>, vector<32x48xf32> -> vector<32x48xf32>
    %c0_9 = arith.constant 0 : index
    %c0_10 = arith.constant 0 : index
    %11 = vector.load %arg5[%c0_9, %c0_10] : memref<1x48xf32, #tpu.memory_space<vmem>>, vector<1x48xf32>
    %12 = vector.broadcast %11 : vector<1x48xf32> to vector<32x48xf32>
    %13 = arith.addf %10, %12 : vector<32x48xf32>
    %cst_11 = arith.constant 0.000000e+00 : f32
    %14 = vector.broadcast %cst_11 : f32 to vector<32x48xf32>
    %15 = arith.maximumf %13, %14 : vector<32x48xf32>
    %16 = arith.truncf %15 : vector<32x48xf32> to vector<32x48xbf16>
    %c0_12 = arith.constant 0 : index
    %c0_13 = arith.constant 0 : index
    %17 = vector.load %arg6[%c0_12, %c0_13] : memref<48x512xbf16, #tpu.memory_space<vmem>>, vector<48x512xbf16>
    %cst_14 = arith.constant dense<0.000000e+00> : vector<32x512xf32>
    %18 = tpu.matmul %16, %17, %cst_14 {dimension_numbers = #tpu.dot_dimension_numbers<[1], [0], [0], [1], [0, 0, 1, 1], [], []>} : vector<32x48xbf16>, vector<48x512xbf16>, vector<32x512xf32> -> vector<32x512xf32>
    %c0_15 = arith.constant 0 : index
    %c0_16 = arith.constant 0 : index
    %19 = vector.load %arg7[%c0_15, %c0_16] : memref<1x512xf32, #tpu.memory_space<vmem>>, vector<1x512xf32>
    %20 = vector.broadcast %19 : vector<1x512xf32> to vector<32x512xf32>
    %21 = arith.addf %18, %20 : vector<32x512xf32>
    %cst_17 = arith.constant 0.000000e+00 : f32
    %22 = vector.broadcast %cst_17 : f32 to vector<32x512xf32>
    %23 = arith.maximumf %21, %22 : vector<32x512xf32>
    %24 = arith.truncf %23 : vector<32x512xf32> to vector<32x512xbf16>
    %c0_18 = arith.constant 0 : index
    %c0_19 = arith.constant 0 : index
    %25 = vector.load %arg8[%c0_18, %c0_19] : memref<512x48xbf16, #tpu.memory_space<vmem>>, vector<512x48xbf16>
    %cst_20 = arith.constant dense<0.000000e+00> : vector<32x48xf32>
    %26 = tpu.matmul %24, %25, %cst_20 {dimension_numbers = #tpu.dot_dimension_numbers<[1], [0], [0], [1], [0, 0, 1, 1], [], []>} : vector<32x512xbf16>, vector<512x48xbf16>, vector<32x48xf32> -> vector<32x48xf32>
    %c0_21 = arith.constant 0 : index
    %c0_22 = arith.constant 0 : index
    %27 = vector.load %arg9[%c0_21, %c0_22] : memref<1x48xf32, #tpu.memory_space<vmem>>, vector<1x48xf32>
    %28 = vector.broadcast %27 : vector<1x48xf32> to vector<32x48xf32>
    %29 = arith.addf %26, %28 : vector<32x48xf32>
    %30 = math.tanh %29 : vector<32x48xf32>
    %31 = arith.truncf %30 : vector<32x48xf32> to vector<32x48xbf16>
    %c0_23 = arith.constant 0 : index
    %c0_24 = arith.constant 0 : index
    %32 = vector.load %arg10[%c0_23, %c0_24] : memref<32x48xbf16, #tpu.memory_space<vmem>>, vector<32x48xbf16>
    tpu.vector_store %arg10[%c0_23, %c0_24], %31 {strides = array<i32>} : memref<32x48xbf16, #tpu.memory_space<vmem>>, vector<32x48xbf16>,
    return
  }
  func.func @transform_0(%arg0: i32) -> (i32, i32) {
    %c0_i32 = arith.constant 0 : i32
    %c0_i32_0 = arith.constant 0 : i32
    return %arg0, %c0_i32 : i32, i32
  }
  func.func @transform_1(%arg0: i32) -> (i32, i32) {
    %c0_i32 = arith.constant 0 : i32
    %c0_i32_0 = arith.constant 0 : i32
    %c0_i32_1 = arith.constant 0 : i32
    return %c0_i32, %c0_i32_0 : i32, i32
  }
  func.func @transform_2(%arg0: i32) -> (i32, i32) {
    %c0_i32 = arith.constant 0 : i32
    %c0_i32_0 = arith.constant 0 : i32
    %c0_i32_1 = arith.constant 0 : i32
    return %c0_i32, %c0_i32_0 : i32, i32
  }
  func.func @transform_3(%arg0: i32) -> (i32, i32) {
    %c0_i32 = arith.constant 0 : i32
    %c0_i32_0 = arith.constant 0 : i32
    %c0_i32_1 = arith.constant 0 : i32
    return %c0_i32, %c0_i32_0 : i32, i32
  }
  func.func @transform_4(%arg0: i32) -> (i32, i32) {
    %c0_i32 = arith.constant 0 : i32
    %c0_i32_0 = arith.constant 0 : i32
    %c0_i32_1 = arith.constant 0 : i32
    return %c0_i32, %c0_i32_0 : i32, i32
  }
  func.func @transform_5(%arg0: i32) -> (i32, i32) {
    %c0_i32 = arith.constant 0 : i32
    %c0_i32_0 = arith.constant 0 : i32
    %c0_i32_1 = arith.constant 0 : i32
    return %c0_i32, %c0_i32_0 : i32, i32
  }
  func.func @transform_6(%arg0: i32) -> (i32, i32) {
    %c0_i32 = arith.constant 0 : i32
    %c0_i32_0 = arith.constant 0 : i32
    %c0_i32_1 = arith.constant 0 : i32
    return %c0_i32, %c0_i32_0 : i32, i32
  }
  func.func @transform_7(%arg0: i32) -> (i32, i32) {
    %c0_i32 = arith.constant 0 : i32
    %c0_i32_0 = arith.constant 0 : i32
    %c0_i32_1 = arith.constant 0 : i32
    return %c0_i32, %c0_i32_0 : i32, i32
  }
  func.func @transform_8(%arg0: i32) -> (i32, i32) {
    %c0_i32 = arith.constant 0 : i32
    %c0_i32_0 = arith.constant 0 : i32
    %c0_i32_1 = arith.constant 0 : i32
    return %c0_i32, %c0_i32_0 : i32, i32
  }
  func.func @transform_9(%arg0: i32) -> (i32, i32) {
    %c0_i32 = arith.constant 0 : i32
    %c0_i32_0 = arith.constant 0 : i32
    return %arg0, %c0_i32 : i32, i32
  }
}

</mosaic_0001>

<bundles_post_ra>
// kernel: tpu_custom_call.1
= control target key start
LH: loop header
LB: loop body
LE: loop exit
PB: predicated region body
PF: predicated region fallthrough
CT: control target
= control target key end

     0   :  { %vm79_vm0 = vcmask 392192   ;;  %s1358_s0 = inlined_call_operand.vmem [shape: bf16[32,48], index: 0, kind: input, shape index: {}]   ;;  %s1359_s1 = inlined_call_operand.vmem [shape: bf16[48,48], index: 1, kind: input, shape index: {}]   ;;  %s1360_s2 = inlined_call_operand.vmem [shape: f32[1,48], index: 2, kind: input, shape index: {}]   ;;  %s1361_s3 = inlined_call_operand.vmem [shape: bf16[48,48], index: 3, kind: input, shape index: {}]   ;;  %s1362_s4 = inlined_call_operand.vmem [shape: f32[1,48], index: 4, kind: input, shape index: {}]   ;;  %s1363_s5 = inlined_call_operand.vmem [shape: bf16[48,512], index: 5, kind: input, shape index: {}]   ;;  %s1364_s6 = inlined_call_operand.vmem [shape: f32[1,512], index: 6, kind: input, shape index: {}]   ;;  %s1365_s7 = inlined_call_operand.vmem [shape: bf16[512,48], index: 7, kind: input, shape index: {}]   ;;  %s1366_s8 = inlined_call_operand.vmem [shape: f32[1,48], index: 8, kind: input, shape index: {}]   ;;  %s1367_s9 = inlined_call_operand.hbm [shape: bf16[32,48], index: 9, kind: output, shape index: {}]  }
   0x1   :  { %v1026_v0 = vld [vmem:[%s1359_s1] sm:$0xff]   ;;  %v1027_v1 = vld [vmem:[%s1359_s1 + $0x8] sm:$0xff]   ;;  %v1028_v3 = vld [vmem:[%s1359_s1 + $0x10] sm:$0xff]  }
   0x2   :  { %1002 = vmatprep.subr.bf16.mxu0 %v1026_v0  ;;  %v1029_v2 = vld [vmem:[%s1358_s0] sm:$0xff]   ;;  %v1030_v5 = vld [vmem:[%s1358_s0 + $0x8] sm:$0xff]  }
   0x3   :  { %1003 = vmatpush3.bf16.msra.mxu0 %v1026_v0  ;;  %1008 = vmatprep.mubr.msk.bf16.mxu0 %vm79_vm0, %v1029_v2  ;;  %v1031_v4 = vld [vmem:[%s1361_s3] sm:$0xff]  }
   0x4   :  { %1004 = vmatprep.subr.bf16.mxu0 %v1027_v1  ;;  %1012 = vmatprep.subr.bf16.mxu1 %v1031_v4 }
   0x5   :  { %1013 = vmatpush3.bf16.msra.mxu1 %v1031_v4 }
   0x7   :  { %1005 = vmatpush3.bf16.msra.mxu0 %v1027_v1 }
   0x8   :  { %1006 = vmatprep.subr.bf16.mxu0 %v1028_v3 }
   0xb   :  { %1007 = vmatpush3.bf16.msra.mxu0 %v1028_v3 }
   0xe   :  { %1009 = vmatmul.mubr.msk.bf16.vlgmr.msra.gmra.mrb[0].mxu0 %vm79_vm0, %v1030_v5 }
   0xf   :  { %14 = vsyncpa [#allocation3], 0  ;;  %v1032_v6 = vld [vmem:[%s1361_s3 + $0x8] sm:$0xff]   ;;  %v1033_v7 = vld [vmem:[%s1361_s3 + $0x10] sm:$0xff]   ;;  %v1116_v35 = vmov 0   ;;  %vm844_vm1 = vcmask 388096  }
  0x10   :  { %1014 = vmatprep.subr.bf16.mxu1 %v1032_v6  ;;  %v1034_v8 = vld [vmem:[%s1363_s5] ss:$16 sps:$4 sm:$0xff]   ;;  %v1036_v9 = vld [vmem:[%s1363_s5 + $0x4] ss:$16 sps:$4 sm:$0xff]   ;;  %v1039_v10 = vld [vmem:[%s1363_s5 + $0xc] ss:$16 sps:$4 sm:$0xff]   ;;  %365 = vmatprep.mubr.bf16.mxu0 %v1116_v35 }
  0x11   :  { %1015 = vmatpush3.bf16.msra.mxu1 %v1032_v6  ;;  %333 = vmatprep.subr.bf16.mxu0 %v1036_v9  ;;  %v865_v11 = vld [vmem:[%s1360_s2] ss:$0 sm:$0xff]  ;;  %v1037_v26 = vld [vmem:[%s1363_s5 + $0x8] ss:$16 sps:$4 sm:$0xff]   ;;  %v1042_v27 = vld [vmem:[%s1363_s5 + $0x24] ss:$16 sps:$4 sm:$0xff]  }
  0x12   :  { %1016 = vmatprep.subr.bf16.mxu1 %v1033_v7  ;;  %334 = vmatpush1.bf16.msra.mxu0 %v1034_v8  ;;  %v1045_v28 = vld [vmem:[%s1363_s5 + $0x2c] ss:$16 sps:$4 sm:$0xff]   ;;  %v1040_v29 = vld [vmem:[%s1363_s5 + $0x20] ss:$16 sps:$4 sm:$0xff]   ;;  %v1043_v30 = vld [vmem:[%s1363_s5 + $0x28] ss:$16 sps:$4 sm:$0xff]  }
  0x13   :  { %335 = vmatprep.subr.bf16.mxu0 %v1042_v27  ;;  %v1048_v31 = vld [vmem:[%s1363_s5 + $0x44] ss:$16 sps:$4 sm:$0xff]   ;;  %v1051_v32 = vld [vmem:[%s1363_s5 + $0x4c] ss:$16 sps:$4 sm:$0xff]   ;;  %v1046_v33 = vld [vmem:[%s1363_s5 + $0x40] ss:$16 sps:$4 sm:$0xff]  }
  0x14   :  { %v1049_v34 = vld [vmem:[%s1363_s5 + $0x48] ss:$16 sps:$4 sm:$0xff]   ;;  %v1052_v36 = vld [vmem:[%s1365_s7 + $0x40] sm:$0xff]   ;;  %v1060_v59 = vld [vmem:[%s1365_s7 + $0x50] sm:$0xff]  }
  0x15   :  { %1017 = vmatpush3.bf16.msra.mxu1 %v1033_v7  ;;  %v1053_v37 = vld [vmem:[%s1365_s7 + $0xc0] sm:$0xff]   ;;  %v1056_v55 = vld [vmem:[%s1365_s7 + $0x48] sm:$0xff]   ;;  %v1061_v60 = vld [vmem:[%s1365_s7 + $0xd0] sm:$0xff]  }
  0x16   :  { %386 = vmatprep.subr.bf16.mxu1 %v1039_v10  ;;  %336 = vmatpush1.bf16.msra.mxu0 %v1040_v29  ;;  %v873_v38 = vld [vmem:[%s1362_s4] ss:$0 sm:$0xff]  ;;  %v1057_v56 = vld [vmem:[%s1365_s7 + $0xc8] sm:$0xff]   ;;  %v1062_v61 = vld [vmem:[%s1365_s7 + $0x10] sm:$0xff]  }
  0x17   :  { %337 = vmatprep.subr.bf16.mxu0 %v1048_v31  ;;  %v1054_v53 = vld [vmem:[%s1365_s7] sm:$0xff]   ;;  %v1058_v57 = vld [vmem:[%s1365_s7 + $0x8] sm:$0xff]   ;;  %v1063_v62 = vld [vmem:[%s1365_s7 + $0x90] sm:$0xff]  }
  0x18   :  { %v1055_v54 = vld [vmem:[%s1365_s7 + $0x80] sm:$0xff]   ;;  %v1059_v58 = vld [vmem:[%s1365_s7 + $0x88] sm:$0xff]   ;;  %v1064_v63 = vld [vmem:[%s1365_s7 + $0x58] sm:$0xff]  }
  0x19   :  { %v1065_v0 = vld [vmem:[%s1365_s7 + $0xd8] sm:$0xff]   ;;  %v1068_v3 = vld [vmem:[%s1365_s7 + $0x60] sm:$0xff]   ;;  %v1072_v7 = vld [vmem:[%s1365_s7 + $0x68] sm:$0xff]  }
  0x1a   :  { %338 = vmatpush1.bf16.msra.mxu0 %v1046_v33  ;;  %v1066_v1 = vld [vmem:[%s1365_s7 + $0x18] sm:$0xff]   ;;  %v1069_v4 = vld [vmem:[%s1365_s7 + $0xe0] sm:$0xff]   ;;  %v1073_v8 = vld [vmem:[%s1365_s7 + $0xe8] sm:$0xff]  }
  0x1b   :  { %946 = vmatprep.subr.bf16.mxu0 %v1052_v36  ;;  %v1067_v2 = vld [vmem:[%s1365_s7 + $0x98] sm:$0xff]   ;;  %v1070_v5 = vld [vmem:[%s1365_s7 + $0x20] sm:$0xff]   ;;  %v1074_v9 = vld [vmem:[%s1365_s7 + $0x28] sm:$0xff]  }
  0x1c   :  { %v1071_v6 = vld [vmem:[%s1365_s7 + $0xa0] sm:$0xff]   ;;  %v1075_v10 = vld [vmem:[%s1365_s7 + $0xa8] sm:$0xff]  }
  0xe1   :  { %v1010_v12 = vpop.f32.mrb[0].mxu0 }
  0xe2   :  { %v129_v13 = vadd.f32 %v1010_v12, %v865_v11  ;;  %v120_v14 = vpop.f32.mrb[1].mxu0  ;;  %v1077_v12 = vld [vmem:[%s1365_s7 + $0xf0] sm:$0xff]  }
  0xe3   :  { %v121_v15 = vadd.f32 %v865_v11, %v120_v14  ;;  %v1011_v16 = vpop.f32.mrb[2].mxu0  ;;  %v1079_v14 = vld [vmem:[%s1365_s7 + $0xb0] sm:$0xff]  }
  0xe4   :  { %v132_v17 = vadd.f32 %v1011_v16, %v865_v11  ;;  %v123_v18 = vpop.f32.mrb[3].mxu0  ;;  %v137_v20 = vmax.f32 %v129_v13, 0.0  ;;  %v1078_v13 = vld [vmem:[%s1365_s7 + $0x30] sm:$0xff]   ;;  %v1081_v16 = vld [vmem:[%s1365_s7 + $0xf8] sm:$0xff]  }
  0xe5   :  { %v124_v19 = vadd.f32 %v865_v11, %v123_v18  ;;  %v135_v22 = vmax.f32 %v121_v15, 0.0  ;;  %v1076_v11 = vld [vmem:[%s1365_s7 + $0x70] sm:$0xff]   ;;  %v1080_v15 = vld [vmem:[%s1365_s7 + $0x78] sm:$0xff]  }
  0xe6   :  { %v138_v21 = vmax.f32 %v132_v17, 0.0  ;;  %v1082_v17 = vld [vmem:[%s1365_s7 + $0x38] sm:$0xff]  }
  0xe7   :  { %v136_v23 = vmax.f32 %v124_v19, 0.0  ;;  %v1083_v18 = vld [vmem:[%s1365_s7 + $0xb8] sm:$0xff]   ;;  %v247_v19 = vlaneseq }
  0xe8   :  { %v140_v24 = vpack.c.bf16 %v138_v21, %v137_v20 }
  0xe9   :  { %v139_v25 = vpack.c.bf16 %v136_v23, %v135_v22  ;;  %v248_v20 = vshrl.u32 %v247_v19, 7  ;;  %v245_v23 = vld [vmem:[%s1364_s6] sm:$0xf] }
  0xeb   :  { %1018 = vmatprep.mubr.msk.bf16.mxu1 %vm79_vm0, %v139_v25  ;;  %v249_v21 = vsub.s32 0, %v248_v20  ;;  %v257_v22 = vsub.s32 2, %v248_v20  ;;  %v261_v25 = vsub.s32 3, %v248_v20 }
  0xec   :  { %1019 = vmatmul.mubr.msk.bf16.vlgmr.msra.gmra.mrb[0].mxu1 %vm79_vm0, %v140_v24  ;;  %v253_v24 = vsub.s32 1, %v248_v20 }
  0xed   :  { %387 = vmatpush1.bf16.msra.mxu1 %v1037_v26  ;;  %418 = vmatprep.mubr.bf16.mxu1 %v1116_v35  ;;  %v250_v26 = vrot.slane %v245_v23, %v249_v21  ;;  %v258_v27 = vrot.slane %v245_v23, %v257_v22  ;;  %v262_v29 = vrot.slane %v245_v23, %v261_v25 }
  0xee   :  { %388 = vmatprep.subr.bf16.mxu1 %v1045_v28  ;;  %v254_v28 = vrot.slane %v245_v23, %v253_v24  ;;  %v895_v24 = vld [vmem:[%s1366_s8] ss:$0 sm:$0xff]  ;;  %s1117_s8 = smov [#allocation2]  }
  0xef   :  { %s854_s13 = sshll.u32 %s1117_s8, 4  ;;  %s855_s13 = int_to_ptr.vmem [resolvable:$true] %s854_s13 }
  0xf0   :  { %s1092_s14 = scalar_lea.vmem %s855_s13, 256  ;;  %p1097_p1 = scmp.lt.s32.totalorder %s855_s13, %s855_s13 }
  0xf1   :  { %389 = vmatpush1.bf16.msra.mxu1 %v1043_v30  ;;  %p1093_p0 = scmp.ne.s32.totalorder %s855_s13, %s1092_s14  ;;  %p1098_p2 = scmp.lt.s32.totalorder %s1092_s14, %s1092_s14 }
  0xf2   :  { %390 = vmatprep.subr.bf16.mxu1 %v1051_v32 }
  0xf3   :  { %p1099_p3 = por %p1098_p2, %p1097_p1 }
  0xf5   :  { %391 = vmatpush1.bf16.msra.mxu1 %v1049_v34  ;;  %p1100_p4 = pnand %p1099_p3, %p1093_p0 }
  0xf6   :  { %974 = vmatprep.subr.bf16.mxu1 %v1053_v37 }
 0x1bf   :  { %v1020_v39 = vpop.f32.mrb[0].mxu1 }
 0x1c0   :  { %v221_v40 = vadd.f32 %v1020_v39, %v873_v38  ;;  %v212_v41 = vpop.f32.mrb[1].mxu1 }
 0x1c1   :  { %v213_v42 = vadd.f32 %v873_v38, %v212_v41  ;;  %v1021_v43 = vpop.f32.mrb[2].mxu1 }
 0x1c2   :  { %v224_v44 = vadd.f32 %v1021_v43, %v873_v38  ;;  %v215_v45 = vpop.f32.mrb[3].mxu1  ;;  %v229_v47 = vmax.f32 %v221_v40, 0.0 }
 0x1c3   :  { %v216_v46 = vadd.f32 %v873_v38, %v215_v45  ;;  %v227_v49 = vmax.f32 %v213_v42, 0.0 }
 0x1c4   :  { %v230_v48 = vmax.f32 %v224_v44, 0.0 }
 0x1c5   :  { %v228_v50 = vmax.f32 %v216_v46, 0.0 }
 0x1c6   :  { %v232_v51 = vpack.c.bf16 %v230_v48, %v229_v47 }
 0x1c7   :  { %v231_v52 = vpack.c.bf16 %v228_v50, %v227_v49 }
 0x1c9   :  { %891 = vmatmul.mubr.msk.bf16.vlgmr.msra.gmra.mrb[4].mxu0 %vm79_vm0, %v231_v52  ;;  %893 = vmatmul.mubr.msk.bf16.vlgmr.msra.gmra.mrb[4].mxu1 %vm79_vm0, %v231_v52 }
 0x1ca   :  { %375 = vmatprep.mubr.bf16.mxu0 %v1116_v35  ;;  %428 = vmatprep.mubr.bf16.mxu1 %v1116_v35 }
 0x1cb   :  { %947 = vmatpush3.bf16.msra.mxu0 %v1054_v53  ;;  %975 = vmatpush3.bf16.msra.mxu1 %v1055_v54 }
 0x1cc   :  { %948 = vmatprep.subr.bf16.mxu0 %v1056_v55  ;;  %976 = vmatprep.subr.bf16.mxu1 %v1057_v56 }
 0x1cf   :  { %949 = vmatpush3.bf16.msra.mxu0 %v1058_v57  ;;  %977 = vmatpush3.bf16.msra.mxu1 %v1059_v58 }
 0x1d0   :  { %950 = vmatprep.subr.bf16.mxu0 %v1060_v59  ;;  %978 = vmatprep.subr.bf16.mxu1 %v1061_v60 }
 0x1d1   :  { %892 = vmatmul.mubr.msk.bf16.gmra.mrb[8].mxu0 %vm79_vm0, %v232_v51  ;;  %894 = vmatmul.mubr.msk.bf16.gmra.mrb[8].mxu1 %vm79_vm0, %v232_v51 }
 0x1d3   :  { %951 = vmatpush3.bf16.msra.mxu0 %v1062_v61  ;;  %979 = vmatpush3.bf16.msra.mxu1 %v1063_v62 }
 0x1d4   :  { %952 = vmatprep.subr.bf16.mxu0 %v1064_v63  ;;  %980 = vmatprep.subr.bf16.mxu1 %v1065_v0 }
 0x1d7   :  { %953 = vmatpush3.bf16.msra.mxu0 %v1066_v1  ;;  %981 = vmatpush3.bf16.msra.mxu1 %v1067_v2 }
 0x1d8   :  { %954 = vmatprep.subr.bf16.mxu0 %v1068_v3  ;;  %982 = vmatprep.subr.bf16.mxu1 %v1069_v4 }
 0x1db   :  { %955 = vmatpush3.bf16.msra.mxu0 %v1070_v5  ;;  %983 = vmatpush3.bf16.msra.mxu1 %v1071_v6 }
 0x1dc   :  { %956 = vmatprep.subr.bf16.mxu0 %v1072_v7  ;;  %984 = vmatprep.subr.bf16.mxu1 %v1073_v8 }
 0x1df   :  { %957 = vmatpush3.bf16.msra.mxu0 %v1074_v9  ;;  %985 = vmatpush3.bf16.msra.mxu1 %v1075_v10 }
 0x1e0   :  { %958 = vmatprep.subr.bf16.mxu0 %v1076_v11  ;;  %986 = vmatprep.subr.bf16.mxu1 %v1077_v12 }
 0x1e3   :  { %959 = vmatpush3.bf16.msra.mxu0 %v1078_v13  ;;  %987 = vmatpush3.bf16.msra.mxu1 %v1079_v14 }
 0x1e4   :  { %960 = vmatprep.subr.bf16.mxu0 %v1080_v15  ;;  %988 = vmatprep.subr.bf16.mxu1 %v1081_v16 }
 0x1e7   :  { %961 = vmatpush3.bf16.msra.mxu0 %v1082_v17  ;;  %989 = vmatpush3.bf16.msra.mxu1 %v1083_v18 }
 0x29c   :  { %v367_v30 = vpop.f32.mrb[4].mxu0  ;;  %v420_v31 = vpop.f32.mrb[4].mxu1 }
 0x29d   :  { %v368_v32 = vadd.f32 %v367_v30, %v250_v26  ;;  %v421_v33 = vadd.f32 %v420_v31, %v258_v27  ;;  %v369_v34 = vpop.f32.mrb[5].mxu0  ;;  %v422_v35 = vpop.f32.mrb[5].mxu1 }
 0x29e   :  { %v370_v36 = vadd.f32 %v369_v34, %v254_v28  ;;  %v423_v37 = vadd.f32 %v422_v35, %v262_v29  ;;  %v371_v38 = vpop.f32.mrb[6].mxu0  ;;  %v424_v39 = vpop.f32.mrb[6].mxu1 }
 0x29f   :  { %v372_v40 = vadd.f32 %v371_v38, %v250_v26  ;;  %v425_v41 = vadd.f32 %v424_v39, %v258_v27  ;;  %v373_v42 = vpop.f32.mrb[7].mxu0  ;;  %v426_v43 = vpop.f32.mrb[7].mxu1  ;;  %v439_v46 = vmax.f32 %v368_v32, 0.0  ;;  %v441_v47 = vmax.f32 %v421_v33, 0.0 }
 0x2a0   :  { %v374_v44 = vadd.f32 %v373_v42, %v254_v28  ;;  %v427_v45 = vadd.f32 %v426_v43, %v262_v29  ;;  %v440_v50 = vmax.f32 %v370_v36, 0.0  ;;  %v442_v51 = vmax.f32 %v423_v37, 0.0 }
 0x2a1   :  { %v443_v48 = vmax.f32 %v372_v40, 0.0  ;;  %v445_v49 = vmax.f32 %v425_v41, 0.0 }
 0x2a2   :  { %v444_v52 = vmax.f32 %v374_v44, 0.0  ;;  %v446_v53 = vmax.f32 %v427_v45, 0.0 }
 0x2a3   :  { %v455_v54 = vpack.c.bf16 %v443_v48, %v439_v46  ;;  %v457_v55 = vpack.c.bf16 %v445_v49, %v441_v47 }
 0x2a4   :  { %v456_v56 = vpack.c.bf16 %v444_v52, %v440_v50  ;;  %v458_v57 = vpack.c.bf16 %v446_v53, %v442_v51  ;;  %v377_v58 = vpop.f32.mrb[8].mxu0  ;;  %v430_v59 = vpop.f32.mrb[8].mxu1 }
 0x2a5   :  { %v378_v60 = vadd.f32 %v377_v58, %v250_v26  ;;  %v431_v61 = vadd.f32 %v430_v59, %v258_v27  ;;  %v379_v62 = vpop.f32.mrb[9].mxu0  ;;  %v432_v63 = vpop.f32.mrb[9].mxu1 }
 0x2a6   :  { %v380_v0 = vadd.f32 %v379_v62, %v254_v28  ;;  %v433_v1 = vadd.f32 %v432_v63, %v262_v29  ;;  %v381_v2 = vpop.f32.mrb[10].mxu0  ;;  %v434_v3 = vpop.f32.mrb[10].mxu1  ;;  %758 = vmatprep.mubr.bf16.mxu0 %v456_v56  ;;  %807 = vmatprep.mubr.bf16.mxu1 %v458_v57 }
 0x2a7   :  { %v382_v4 = vadd.f32 %v381_v2, %v250_v26  ;;  %v435_v5 = vadd.f32 %v434_v3, %v258_v27  ;;  %v383_v6 = vpop.f32.mrb[11].mxu0  ;;  %v436_v7 = vpop.f32.mrb[11].mxu1  ;;  %759 = vmatmul.mubr.bf16.vlgmr.msra.gmra.mrb[12].mxu0 %v455_v54  ;;  %808 = vmatmul.mubr.bf16.vlgmr.msra.gmra.mrb[12].mxu1 %v457_v55  ;;  %v447_v10 = vmax.f32 %v378_v60, 0.0  ;;  %v449_v11 = vmax.f32 %v431_v61, 0.0 }
 0x2a8   :  { %v384_v8 = vadd.f32 %v383_v6, %v254_v28  ;;  %v437_v9 = vadd.f32 %v436_v7, %v262_v29  ;;  %v448_v14 = vmax.f32 %v380_v0, 0.0  ;;  %v450_v15 = vmax.f32 %v433_v1, 0.0 }
 0x2a9   :  { %v451_v12 = vmax.f32 %v382_v4, 0.0  ;;  %v453_v13 = vmax.f32 %v435_v5, 0.0 }
 0x2aa   :  { %v452_v16 = vmax.f32 %v384_v8, 0.0  ;;  %v454_v17 = vmax.f32 %v437_v9, 0.0 }
 0x2ab   :  { %v459_v18 = vpack.c.bf16 %v451_v12, %v447_v10  ;;  %v461_v19 = vpack.c.bf16 %v453_v13, %v449_v11 }
 0x2ac   :  { %v460_v20 = vpack.c.bf16 %v452_v16, %v448_v14  ;;  %v462_v21 = vpack.c.bf16 %v454_v17, %v450_v15 }
 0x2ae   :  { %766 = vmatprep.mubr.bf16.mxu0 %v460_v20  ;;  %815 = vmatprep.mubr.bf16.mxu1 %v462_v21 }
 0x2af   :  { %767 = vmatmul.mubr.bf16.gmra.mrb[16].mxu0 %v459_v18  ;;  %816 = vmatmul.mubr.bf16.gmra.mrb[16].mxu1 %v461_v19 }
 0x37a   :  { %v962_v22 = vpop.f32.mrb[12].mxu0  ;;  %v990_v23 = vpop.f32.mrb[12].mxu1 }
 0x37b   :  { %v963_v25 = vpop.f32.mrb[13].mxu0  ;;  %v991_v26 = vpop.f32.mrb[13].mxu1 }
 0x37c   :  { %v964_v27 = vadd.f32 %v963_v25, %v962_v22  ;;  %v992_v28 = vadd.f32 %v991_v26, %v990_v23  ;;  %v965_v29 = vpop.f32.mrb[14].mxu0  ;;  %v993_v30 = vpop.f32.mrb[14].mxu1 }
 0x37d   :  { %v966_v31 = vpop.f32.mrb[15].mxu0  ;;  %v994_v32 = vpop.f32.mrb[15].mxu1 }
 0x37e   :  { %v761_v33 = vadd.f32 %v964_v27, %v895_v24  ;;  %v967_v34 = vadd.f32 %v966_v31, %v965_v29  ;;  %v995_v35 = vadd.f32 %v994_v32, %v993_v30 }
 0x380   :  { %v810_v36 = vadd.f32 %v992_v28, %v761_v33  ;;  %v764_v37 = vadd.f32 %v967_v34, %v895_v24 }
 0x382   :  { %1084 = vtanh.f32 %v810_v36  ;;  %v813_v38 = vadd.f32 %v995_v35, %v764_v37  ;;  %v968_v39 = vpop.f32.mrb[16].mxu0  ;;  %v996_v40 = vpop.f32.mrb[16].mxu1 }
 0x383   :  { %v969_v41 = vpop.f32.mrb[17].mxu0  ;;  %v997_v42 = vpop.f32.mrb[17].mxu1 }
 0x384   :  { %1086 = vtanh.f32 %v813_v38  ;;  %v970_v43 = vadd.f32 %v969_v41, %v968_v39  ;;  %v998_v44 = vadd.f32 %v997_v42, %v996_v40  ;;  %v971_v45 = vpop.f32.mrb[18].mxu0  ;;  %v999_v46 = vpop.f32.mrb[18].mxu1 }
 0x385   :  { %v972_v47 = vpop.f32.mrb[19].mxu0  ;;  %v1000_v48 = vpop.f32.mrb[19].mxu1 }
 0x386   :  { %v769_v49 = vadd.f32 %v970_v43, %v895_v24  ;;  %v973_v50 = vadd.f32 %v972_v47, %v971_v45  ;;  %v1001_v51 = vadd.f32 %v1000_v48, %v999_v46 }
 0x388   :  { %v818_v52 = vadd.f32 %v998_v44, %v769_v49  ;;  %v772_v53 = vadd.f32 %v973_v50, %v895_v24 }
 0x38a   :  { %1088 = vtanh.f32 %v818_v52  ;;  %v821_v54 = vadd.f32 %v1001_v51, %v772_v53 }
 0x38c   :  { %v1085_v55 = vpop.eup %1084  ;;  %1090 = vtanh.f32 %v821_v54 }
 0x38d   :  { %v932_v56 = vpack.c.bf16 %v1085_v55, %v1085_v55 }
 0x38e   :  { %v1087_v57 = vpop.eup %1086 }
 0x38f   :  { %845 = vst.msk [vmem:[#allocation2] sm:$0xf] %vm844_vm1, %v932_v56  ;;  %v933_v58 = vpack.c.bf16 %v1087_v57, %v1087_v57 }
 0x391   :  { %846 = vst.msk [vmem:[#allocation2 + $0x4] sm:$0xf] %vm844_vm1, %v933_v58 }
 0x394   :  { %v1089_v59 = vpop.eup %1088 }
 0x395   :  { %v934_v60 = vpack.c.bf16 %v1089_v59, %v1089_v59 }
 0x396   :  { %v1091_v61 = vpop.eup %1090 }
 0x397   :  { %847 = vst.msk [vmem:[#allocation2 + $0x8] sm:$0xf] %vm844_vm1, %v934_v60  ;;  %v935_v62 = vpack.c.bf16 %v1091_v61, %v1091_v61 }
 0x399   :  { %848 = vst.msk [vmem:[#allocation2 + $0xc] sm:$0xf] %vm844_vm1, %v935_v62 }
 0x39a   :  { %1103 = shalt.err (!%p1100_p4)
}
 0x39b   :  { %s1104_s17 = scalar_lea.hbm %s1367_s9, 256 }
 0x39c   :  { %p1105_p5 = scmp.ne.s32.totalorder %s1367_s9, %s1104_s17  ;;  %p1108_p6 = scmp.lt.u32.totalorder %s1104_s17, %s1367_s9 }
 0x39e   :  { %p1110_p7 = pnand %p1108_p6, %p1105_p5 }
 0x3a0   :  { %1113 = shalt.err (!%p1110_p7)
}
 0x3a1   :  { %s1118_s1 = smov 64   ;;  %s1119_s22 = smov 4  }
 0x3a2   :  { %860 = dma.vmem_to_hbm [thread:$0]  %s855_s13, 256, %s1367_s9, [#allocation3], %s1118_s1, %s1118_s1, %s1119_s22  }
 0x3a3   :  { %1114 = dma.done.wait [#allocation3], 256  }
 0x3a4   :  { %1115 = vsyncadd [#allocation3], 4294967040 }
 0x3a5   :  { %864 = vsyncpa [#allocation3], 1 }

</bundles_post_ra>
